<compile_context>
chip_gen: v6e
topology: v6e:2x2x1
jax: 0.10.0
libtpu: 0.0.40
codegen_flags: <defaults>
</compile_context>

<pallas_src>
from typing import NamedTuple

import jax
import jax.numpy as jnp
from jax import lax
from jax.experimental import pallas as pl
from jax.experimental.pallas import tpu as pltpu

_EPS = 1e-12            # matches torch.nn.functional.normalize default eps
_EPS_SQ = _EPS * _EPS   # rsqrt(max(sumsq, eps^2)) == 1 / max(||x||, eps)
_COMPUTE_DTYPE = jnp.bfloat16


def _round_up(x, m):
    return ((x + m - 1) // m) * m


def _cdiv(a, b):
    return -(-a // b)


def _vmem_budget_bytes():
    """~75% of per-core VMEM (≈48 MiB on v7x, ≈96 MiB on v5e/v6e), capped."""
    cap = 64 * 1024 * 1024
    try:
        info = pltpu.get_tpu_info()
        cap = int(getattr(info, "vmem_capacity_bytes", cap))
    except Exception:
        pass
    return int(min(cap * 3 // 4, 100 * 1024 * 1024))


def _working_set_bytes(tm, tn, tk, in_itemsize, out_itemsize):
    return (2 * (tm * tk + tn * tk) * in_itemsize   # double-buffered x / w tiles
            + 2 * (tm + tn) * 4                     # inv_x / inv_w tiles
            + 2 * tm * tn * out_itemsize            # double-buffered output tile
            + tm * tn * 4)                          # f32 accumulator scratch


def _select_tiling(C, D, *, tm_cap, tn_cap, tk_cap, vmem_budget,
                   in_itemsize, out_itemsize=4):
    C128 = _round_up(max(C, 1), 128)
    D128 = _round_up(max(D, 1), 128)
    # Keep >= 2 class tiles when possible so v7x's second TensorCore has work
    # even when the whole batch fits a single tile (grid = (nj, 1, nk)).
    if C128 >= 256:
        tn_cap = min(tn_cap, _round_up(_cdiv(C128, 2), 128))
    tn_cap = max(128, min(tn_cap, C128))
    tk_cap = max(128, min(tk_cap, D128))
    tm = max(8, _round_up(tm_cap, 8))

    while True:
        nj = _cdiv(C128, tn_cap)
        tn = _round_up(_cdiv(C128, nj), 128)
        nk = _cdiv(D128, tk_cap)
        tk = _round_up(_cdiv(D128, nk), 128)
        if _working_set_bytes(tm, tn, tk, in_itemsize, out_itemsize) <= vmem_budget:
            break
        if tk_cap > 128:          # shrinking K is free: no extra HBM traffic
            tk_cap = max(128, tk_cap // 2)
        elif tn_cap > 128:
            tn_cap = max(128, tn_cap // 2)
        elif tm > 8:
            tm = max(8, tm // 2)
        else:
            # TODO(synk): pathological D where even minimal tiles miss the VMEM
            # budget; would need a manually pipelined HBM K loop.
            break

    Cp = _round_up(C128, tn)
    Dp = _round_up(D128, tk)
    return tm, tn, tk, Cp, Dp


class ClassifierState(NamedTuple):
    w: jax.Array          # [Cp, Dp] bf16, zero-padded classifier weights
    inv_w: jax.Array      # [1, Cp]  f32 inverse row L2 norms
    num_classes: int
    in_features: int
    Cp: int
    Dp: int
    tm_cap: int
    tn: int
    tk: int
    vmem_budget: int


def prepare_classifier(weight, *, tm_cap=256, tn_cap=2048, tk_cap=2048,
                       vmem_budget=None):
    """One-time weight preparation (call at init / after add_weight/set_weight).

    Pads to lane-dense tiles, casts to bf16, and precomputes f32 inverse row
    norms so the forward pass reads the weight from HBM exactly once.
    """
    C, D = weight.shape
    if vmem_budget is None:
        vmem_budget = _vmem_budget_bytes()
    tm_cap, tn, tk, Cp, Dp = _select_tiling(
        C, D, tm_cap=tm_cap, tn_cap=tn_cap, tk_cap=tk_cap,
        vmem_budget=vmem_budget,
        in_itemsize=jnp.dtype(_COMPUTE_DTYPE).itemsize)

    w_f32 = weight.astype(jnp.float32)
    inv_w = lax.rsqrt(jnp.maximum(jnp.sum(w_f32 * w_f32, axis=-1), _EPS_SQ))
    inv_w = jnp.pad(inv_w, (0, Cp - C)).reshape(1, Cp)
    w_p = jnp.pad(weight, ((0, Cp - C), (0, Dp - D))).astype(_COMPUTE_DTYPE)

    return ClassifierState(w=w_p, inv_w=inv_w, num_classes=C, in_features=D,
                           Cp=Cp, Dp=Dp, tm_cap=tm_cap, tn=tn, tk=tk,
                           vmem_budget=int(vmem_budget))


def _cosine_head_kernel(x_ref, w_ref, invx_ref, invw_ref, o_ref, acc_ref):
    k = pl.program_id(2)

    @pl.when(k == 0)
    def _init():
        acc_ref[...] = jnp.zeros_like(acc_ref)

    # Un-normalized logits on the MXU: contract the feature (last) dim of both
    # operands directly (no transpose), bf16 operands, f32 accumulation.
    acc_ref[...] += lax.dot_general(
        x_ref[...], w_ref[...],
        dimension_numbers=(((1,), (1,)), ((), ())),
        preferred_element_type=jnp.float32)

    @pl.when(k == pl.num_programs(2) - 1)
    def _finalize():
        # Scale the small [tm, tn] tile by the outer product of precomputed
        # f32 inverse norms instead of normalizing the big operands.
        o_ref[...] = (acc_ref[...] * invx_ref[...] * invw_ref[...]
                      ).astype(o_ref.dtype)


def vision_classifier_forward(x, state: ClassifierState):
    """x: [B, D] features -> [B, C] cosine-similarity logits."""
    B, D = x.shape
    assert D == state.in_features, "in_features mismatch between x and weight"
    out_dtype = x.dtype

    tn, tk, Cp, Dp = state.tn, state.tk, state.Cp, state.Dp
    nj = Cp // tn
    nk = Dp // tk

    # Adaptive batch tile: avoid rounding Bp far past B.
    B8 = _round_up(B, 8)
    ni = _cdiv(B8, state.tm_cap)
    tm = _round_up(_cdiv(B8, ni), 8)
    Bp = _round_up(B8, tm)
    ni = Bp // tm

    # Per-row inverse L2 norm of x, hoisted out of the kernel (computed once in
    # f32 here instead of nj*nk times over a [tm, tk] tile inside the grid).
    x_f32 = x.astype(jnp.float32)
    inv_x = lax.rsqrt(jnp.maximum(
        jnp.sum(x_f32 * x_f32, axis=-1, keepdims=True), _EPS_SQ))
    inv_x = jnp.pad(inv_x, ((0, Bp - B), (0, 0)))

    x_p = jnp.pad(x, ((0, Bp - B), (0, Dp - D))).astype(_COMPUTE_DTYPE)

    in_itemsize = jnp.dtype(_COMPUTE_DTYPE).itemsize
    out_itemsize = jnp.dtype(out_dtype).itemsize
    cost = pl.CostEstimate(
        flops=2 * Bp * Cp * Dp + 2 * Bp * Cp,
        transcendentals=0,
        bytes_accessed=(Bp * Dp * nj + Cp * Dp) * in_itemsize
                       + Cp * 4 + Bp * 4 + Bp * Cp * out_itemsize)

    grid_spec = pltpu.PrefetchScalarGridSpec(
        num_scalar_prefetch=0,
        # Class tiles outermost (weight tile reused across batch), contraction
        # innermost so the f32 accumulator scratch is valid.
        grid=(nj, ni, nk),
        in_specs=[
            pl.BlockSpec((tm, tk), lambda j, i, k: (i, k)),   # x tile
            pl.BlockSpec((tn, tk), lambda j, i, k: (j, k)),   # weight tile
            pl.BlockSpec((tm, 1), lambda j, i, k: (i, 0)),    # 1/||x|| column
            pl.BlockSpec((1, tn), lambda j, i, k: (0, j)),    # 1/||w|| row
        ],
        out_specs=pl.BlockSpec((tm, tn), lambda j, i, k: (i, j)),
        scratch_shapes=[pltpu.VMEM((tm, tn), jnp.float32)],
    )

    out_p = pl.pallas_call(
        _cosine_head_kernel,
        out_shape=jax.ShapeDtypeStruct((Bp, Cp), out_dtype),
        grid_spec=grid_spec,
        compiler_params=pltpu.CompilerParams(
            dimension_semantics=("parallel", "parallel", "arbitrary"),
            vmem_limit_bytes=int(state.vmem_budget)),
        cost_estimate=cost,
    )(x_p, state.w, inv_x, state.inv_w)

    return out_p[:B, :state.num_classes]


# ----------------------------------------------------------------------------
# References for the self-test.
# ----------------------------------------------------------------------------
def _reference_f32(x, weight):
    xn = x / jnp.maximum(jnp.linalg.norm(x, axis=-1, keepdims=True), _EPS)
    wn = weight / jnp.maximum(jnp.linalg.norm(weight, axis=-1, keepdims=True), _EPS)
    return jnp.einsum("bd,cd->bc", xn, wn, precision=lax.Precision.HIGHEST)


def _reference_bf16(x, weight):
    # Emulates the kernel numerics: bf16 MXU operands, f32 accumulation,
    # post-matmul scaling by f32 inverse norms.
    xf = x.astype(jnp.float32)
    wf = weight.astype(jnp.float32)
    inv_x = lax.rsqrt(jnp.maximum(jnp.sum(xf * xf, -1, keepdims=True), _EPS_SQ))
    inv_w = lax.rsqrt(jnp.maximum(jnp.sum(wf * wf, -1, keepdims=True), _EPS_SQ))
    s = jnp.einsum("bd,cd->bc",
                   x.astype(_COMPUTE_DTYPE).astype(jnp.float32),
                   weight.astype(_COMPUTE_DTYPE).astype(jnp.float32),
                   precision=lax.Precision.HIGHEST)
    return s * inv_x * inv_w.T


if __name__ == "__main__":
    key = jax.random.PRNGKey(0)
    k_x, k_w, k_x2, k_w2 = jax.random.split(key, 4)

    # Test 1: small head; exercises D-padding, C-padding, ragged B, nj > 1.
    B, D, C = 12, 40, 200
    x = jax.random.normal(k_x, (B, D), dtype=jnp.float32)
    w = jax.random.normal(k_w, (C, D), dtype=jnp.float32) * 0.02
    state = prepare_classifier(w)                       # one-time weight prep
    out = jax.block_until_ready(vision_classifier_forward(x, state))
    assert out.shape == (B, C)
    assert jnp.allclose(out, _reference_bf16(x, w), atol=1e-4, rtol=1e-4), \
        "mismatch vs bf16-operand reference"
    assert jnp.allclose(out, _reference_f32(x, w), atol=2e-2, rtol=2e-2), \
        "mismatch vs f32 reference"

    # Test 2: force multi-tile batch (ni>1), multi-class tiles (nj>1) and
    # K accumulation (nk>1) via small tile caps.
    B2, D2, C2 = 20, 300, 130
    x2 = jax.random.normal(k_x2, (B2, D2), dtype=jnp.float32)
    w2 = jax.random.normal(k_w2, (C2, D2), dtype=jnp.float32) * 0.02
    state2 = prepare_classifier(w2, tm_cap=8, tn_cap=128, tk_cap=128)
    out2 = jax.block_until_ready(vision_classifier_forward(x2, state2))
    assert out2.shape == (B2, C2)
    assert jnp.allclose(out2, _reference_bf16(x2, w2), atol=1e-4, rtol=1e-4), \
        "mismatch vs bf16-operand reference (multi-tile)"
    assert jnp.allclose(out2, _reference_f32(x2, w2), atol=2e-2, rtol=2e-2), \
        "mismatch vs f32 reference (multi-tile)"

    print("KERNEL_OK")
</pallas_src>

<mosaic_0001>
module attributes {stable_mosaic.version = 11 : i64} {
  func.func @_cosine_head_kernel(%arg0: i32, %arg1: i32, %arg2: i32, %arg3: memref<16x128xbf16, #tpu.memory_space<vmem>>, %arg4: memref<128x128xbf16, #tpu.memory_space<vmem>>, %arg5: memref<16x1xf32, #tpu.memory_space<vmem>>, %arg6: memref<1x128xf32, #tpu.memory_space<vmem>>, %arg7: memref<16x128xf32, #tpu.memory_space<vmem>>, %arg8: memref<16x128xf32, #tpu.memory_space<vmem>>) attributes {dimension_semantics = [#tpu.dimension_semantics<parallel>, #tpu.dimension_semantics<parallel>, #tpu.dimension_semantics<arbitrary>], iteration_bounds = array<i64: 2, 1, 1>, scalar_prefetch = 0 : i64, scratch_operands = 1 : i64, tpu.core_type = #tpu.core_type<tc>, window_params = [{transform_indices = @transform_0, window_bounds = array<i64: 16, 128>}, {transform_indices = @transform_1, window_bounds = array<i64: 128, 128>}, {transform_indices = @transform_2, window_bounds = array<i64: 16, 1>}, {transform_indices = @transform_3, window_bounds = array<i64: 1, 128>}, {transform_indices = @transform_4, window_bounds = array<i64: 16, 128>}]} {
    %c0_i32 = arith.constant 0 : i32
    %0 = arith.cmpi eq, %arg2, %c0_i32 : i32
    %1 = arith.extui %0 : i1 to i32
    %c0_i32_0 = arith.constant 0 : i32
    %2 = arith.cmpi ne, %1, %c0_i32_0 : i32
    scf.if %2 {
      %cst_10 = arith.constant 0.000000e+00 : f32
      %12 = vector.broadcast %cst_10 : f32 to vector<16x128xf32>
      %c0_11 = arith.constant 0 : index
      %c0_12 = arith.constant 0 : index
      %13 = vector.load %arg8[%c0_11, %c0_12] : memref<16x128xf32, #tpu.memory_space<vmem>>, vector<16x128xf32>
      tpu.vector_store %arg8[%c0_11, %c0_12], %12 {strides = array<i32>} : memref<16x128xf32, #tpu.memory_space<vmem>>, vector<16x128xf32>,
    } else {
    }
    %c0 = arith.constant 0 : index
    %c0_1 = arith.constant 0 : index
    %3 = vector.load %arg8[%c0, %c0_1] : memref<16x128xf32, #tpu.memory_space<vmem>>, vector<16x128xf32>
    %c0_2 = arith.constant 0 : index
    %c0_3 = arith.constant 0 : index
    %4 = vector.load %arg3[%c0_2, %c0_3] : memref<16x128xbf16, #tpu.memory_space<vmem>>, vector<16x128xbf16>
    %c0_4 = arith.constant 0 : index
    %c0_5 = arith.constant 0 : index
    %5 = vector.load %arg4[%c0_4, %c0_5] : memref<128x128xbf16, #tpu.memory_space<vmem>>, vector<128x128xbf16>
    %cst = arith.constant dense<0.000000e+00> : vector<16x128xf32>
    %6 = tpu.matmul %4, %5, %cst {dimension_numbers = #tpu.dot_dimension_numbers<[1], [1], [0], [0], [0, 0, 1, 0], [], []>} : vector<16x128xbf16>, vector<128x128xbf16>, vector<16x128xf32> -> vector<16x128xf32>
    %7 = arith.addf %3, %6 : vector<16x128xf32>
    %c0_6 = arith.constant 0 : index
    %c0_7 = arith.constant 0 : index
    %8 = vector.load %arg8[%c0_6, %c0_7] : memref<16x128xf32, #tpu.memory_space<vmem>>, vector<16x128xf32>
    tpu.vector_store %arg8[%c0_6, %c0_7], %7 {strides = array<i32>} : memref<16x128xf32, #tpu.memory_space<vmem>>, vector<16x128xf32>,
    %c0_i32_8 = arith.constant 0 : i32
    %9 = arith.cmpi eq, %arg2, %c0_i32_8 : i32
    %10 = arith.extui %9 : i1 to i32
    %c0_i32_9 = arith.constant 0 : i32
    %11 = arith.cmpi ne, %10, %c0_i32_9 : i32
    scf.if %11 {
      %c0_10 = arith.constant 0 : index
      %c0_11 = arith.constant 0 : index
      %12 = vector.load %arg8[%c0_10, %c0_11] : memref<16x128xf32, #tpu.memory_space<vmem>>, vector<16x128xf32>
      %c0_12 = arith.constant 0 : index
      %c0_13 = arith.constant 0 : index
      %13 = vector.load %arg5[%c0_12, %c0_13] : memref<16x1xf32, #tpu.memory_space<vmem>>, vector<16x1xf32>
      %14 = vector.broadcast %13 : vector<16x1xf32> to vector<16x128xf32>
      %15 = arith.mulf %12, %14 : vector<16x128xf32>
      %c0_14 = arith.constant 0 : index
      %c0_15 = arith.constant 0 : index
      %16 = vector.load %arg6[%c0_14, %c0_15] : memref<1x128xf32, #tpu.memory_space<vmem>>, vector<1x128xf32>
      %17 = vector.broadcast %16 : vector<1x128xf32> to vector<16x128xf32>
      %18 = arith.mulf %15, %17 : vector<16x128xf32>
      %c0_16 = arith.constant 0 : index
      %c0_17 = arith.constant 0 : index
      %19 = vector.load %arg7[%c0_16, %c0_17] : memref<16x128xf32, #tpu.memory_space<vmem>>, vector<16x128xf32>
      tpu.vector_store %arg7[%c0_16, %c0_17], %18 {strides = array<i32>} : memref<16x128xf32, #tpu.memory_space<vmem>>, vector<16x128xf32>,
    } else {
    }
    return
  }
  func.func @transform_0(%arg0: i32, %arg1: i32, %arg2: i32) -> (i32, i32) {
    %c0_i32 = arith.constant 0 : i32
    return %arg1, %arg2 : i32, i32
  }
  func.func @transform_1(%arg0: i32, %arg1: i32, %arg2: i32) -> (i32, i32) {
    %c0_i32 = arith.constant 0 : i32
    return %arg0, %arg2 : i32, i32
  }
  func.func @transform_2(%arg0: i32, %arg1: i32, %arg2: i32) -> (i32, i32) {
    %c0_i32 = arith.constant 0 : i32
    %c0_i32_0 = arith.constant 0 : i32
    return %arg1, %c0_i32 : i32, i32
  }
  func.func @transform_3(%arg0: i32, %arg1: i32, %arg2: i32) -> (i32, i32) {
    %c0_i32 = arith.constant 0 : i32
    %c0_i32_0 = arith.constant 0 : i32
    return %c0_i32, %arg0 : i32, i32
  }
  func.func @transform_4(%arg0: i32, %arg1: i32, %arg2: i32) -> (i32, i32) {
    %c0_i32 = arith.constant 0 : i32
    return %arg1, %arg0 : i32, i32
  }
}

</mosaic_0001>

<bundles_post_ra>
// kernel: tpu_custom_call.1
= control target key start
LH: loop header
LB: loop body
LE: loop exit
PB: predicated region body
PF: predicated region fallthrough
CT: control target
= control target key end

     0   :  { %9 = vsyncpa [#allocation4], 0  ;;  %s1065_s0 = inlined_call_operand.vmem [shape: bf16[16,128], index: 0, kind: input, shape index: {}]   ;;  %s1066_s1 = inlined_call_operand.hbm [shape: bf16[256,128], index: 1, kind: input, shape index: {}]   ;;  %s1067_s2 = inlined_call_operand.vmem [shape: f32[16,1], index: 2, kind: input, shape index: {}]   ;;  %s1068_s3 = inlined_call_operand.vmem [shape: f32[1,256], index: 3, kind: input, shape index: {}]   ;;  %s1069_s4 = inlined_call_operand.hbm [shape: f32[16,256], index: 4, kind: output, shape index: {}]  }
   0x1   :  { %11 = vsyncpa [#allocation4 + $0x1], 0 }
   0x2   :  { %12 = vsyncpa [#allocation5], 0 }
   0x3   :  { %14 = vsyncpa [#allocation5 + $0x1], 0  ;;  %s894_s15 = smov 0   ;;  %s896_s16 = smov 0  }
   0x4   :  { %s898_s17 = smov 0   ;;  %s900_s18 = smov 0  }
   0x5   :  { %s902_s19 = smov 0   ;;  %s904_s20 = smov 0  }
   0x6 LB: > { %s613_s21 = sadd.s32 4294967295, %s857_s20   ;;  %s614_s22 = sadd.s32 4294967294, %s857_s20   ;;  %s857_s20 = sphi %s904_s20, %s20_s20   ;;  %s853_s19 = sphi %s902_s19, %s1080_s19   ;;  %s849_s18 = sphi %s900_s18, %s1079_s18   ;;  %s845_s17 = sphi %s898_s17, %s1078_s17   ;;  %s841_s16 = sphi %s896_s16, %s1077_s16   ;;  %s837_s15 = sphi %s894_s15, %s1076_s15  }
   0x7   : > { %s39_s23 = sadd.s32 1, %s853_s19  ;;  %s76_s24 = sadd.s32 1, %s845_s17 }
   0x8   : > { %p41_p0 = scmp.ge.s32.totalorder %s39_s23, 2  ;;  %p83_p1 = scmp.ne.s32.totalorder %s845_s17, %s841_s16 }
   0x9   : > { %p84_p2 = scmp.eq.s32.totalorder %s857_s20, 0  ;;  %p89_p3 = scmp.ne.s32.totalorder %s841_s16, %s837_s15 }
   0xa   : > { %s1082_s23 = smov (%p41_p0, %s39_s23), 0  ;;  %p90_p5 = scmp.eq.s32.totalorder %s613_s21, 0 }
   0xb   : > { %p935_p4 = por %p84_p2, %p83_p1  ;;  %s71_s26 = ssub.s32 %s853_s19, %s1082_s23 }
   0xc   : > { %p167_p6 = scmp.eq.s32.totalorder %s613_s21, 1  ;;  %p74_p7 = scmp.eq.s32.totalorder %s71_s26, 0 }
   0xd   : > { %p941_p8 = por %p90_p5, %p89_p3  ;;  %p173_p10 = scmp.eq.s32.totalorder %s614_s22, 1 }
   0xe   : > { %p945_p9 = por %p167_p6, %p83_p1  ;;  %p681_p13 = scmp.lt.s32.totalorder %s857_s20, 2 }
   0xf   : > { %s950_s29 = scalar_select %p74_p7, %s845_s17, %s76_s24  }
  0x10   : > { %p952_p11 = por %p173_p10, %p89_p3  ;;  %s214_s5 = sand.u32 1, %s845_s17  }
  0x11   : > { %s619_s6 = sshll.u32 %s214_s5, 6  ;;  %s639_s7 = sshll.u32 %s853_s19, 10 }
  0x12   : > { %s225_s10 = scalar_lea.hbm %s1066_s1, %s639_s7  ;;  %s218_s11 = scalar_lea.vmem [#allocation3], %s619_s6 }
  0x13   : > { %s226_s12 = sshll.u32 %s218_s11, 4  ;;  %p965_p0 = pnand %p681_p13, %p935_p4  ;;  %s227_s12 = int_to_ptr.vmem [resolvable:$true] %s226_s12 }
  0x14   : > { %p622_p1 = scmp.ge.s32.totalorder %s857_s20, 1  ;;  %s215_s14 = scalar_lea.sflag [#allocation4], %s214_s5 }
  0x15   : > { %p751_p2 = pneg %p965_p0  ;;  %s762_s21 = scalar_lea.vmem %s227_s12, 1024 }
  0x16   : > { %p763_p3 = scmp.ne.s32.totalorder %s227_s12, %s762_s21  ;;  %s859_s22 = smov [#allocation3]  }
  0x17   : > { %s767_s24 = sshll.u32 %s859_s22, 4  ;;  %s768_s24 = int_to_ptr.vmem [resolvable:$false] %s767_s24 }
  0x18   : > { %p765_p5 = pnand %p763_p3, %p751_p2  ;;  %s769_s26 = scalar_lea.vmem %s768_s24, 2048 }
  0x19   : > { %p770_p7 = scmp.lt.s32.totalorder %s227_s12, %s768_s24  ;;  %p771_p10 = scmp.lt.s32.totalorder %s769_s26, %s762_s21 }
  0x1a   : > { %p766_p6 = pneg %p765_p5 }
  0x1b   : > { %p772_p12 = por %p771_p10, %p770_p7 }
  0x1d   : > { %p773_p4 = pnand %p772_p12, %p766_p6 }
  0x1f   : > { %776 = shalt.err (!%p773_p4)
}
  0x20   : > { %s860_s25 = smov 64   ;;  %s861_s5 = smov 4  }
  0x21   : > { %676 = dma.hbm_to_vmem [thread:$0]  (!%p965_p0), %s225_s10, 1024, %s227_s12, %s215_s14, %s860_s25, %s860_s25, %s861_s5  }
  0x22   : > { %p240_p13 = scmp.lt.s32.totalorder %s857_s20, 3 }
  0x24   : > { %p241_p2 = pnand %p622_p1, %p240_p13 }
  0x25   : > { %s978_s6 = sand.u32 (!%p241_p2), 1, %s841_s16  }
  0x26   : > { %244 = sbr.rel (%p241_p2) target bundleno = 325 (0x145), region = 36  ;;  %s623_s7 = sshll.u32 (!%p241_p2), %s978_s6, 6 }
  0x27   : > { %s247_s8 = scalar_lea.sflag (!%p241_p2), [#allocation4], %s978_s6  ;;  %s982_s9 = scalar_lea.vmem (!%p241_p2), [#allocation3], %s623_s7 }
  0x2b   : > { %828 = dma.done.wait (%p941_p8), %s247_s8, 1024  }
  0x2c   : > { %830 = vsyncadd (%p941_p8), %s247_s8, 4294966272  ;;  %v862_v0 = vmov 0.0   ;;  %vm863_vm0 = vmmov 0   ;;  %v864_v1 = vmov 0   ;;  %v740_v2 = vld [vmem:[%s982_s9 + $0x38] sm:$0xff]   ;;  %v741_v3 = vld [vmem:[%s982_s9 + $0x30] sm:$0xff]  }
  0x2d   : > { %649 = vmatprep.subr.bf16.mxu0 %v862_v0  ;;  %665 = vmatprep.mubr.msk.bf16.mxu0 %vm863_vm0, %v862_v0  ;;  %v442_v4 = vld [vmem:[%s1067_s2] sm:$0xff]  ;;  %v443_v5 = vld [vmem:[%s1067_s2 + $0x8] sm:$0xff]  ;;  %v744_v8 = vld [vmem:[%s982_s9 + $0x18] sm:$0xff]   ;;  %p307_p8 = scmp.lt.s32.totalorder %s849_s18, 1  ;;  %s624_s25 = sshll.u32 %s978_s6, 4 }
  0x2e   : > { %739 = vset.pattern.permute.xlu0 %v864_v1  ;;  %650 = vmatpush3.bf16.xpose.msra.mxu0 %v740_v2  ;;  %v742_v6 = vld [vmem:[%s982_s9 + $0x28] sm:$0xff]   ;;  %v743_v7 = vld [vmem:[%s982_s9 + $0x20] sm:$0xff]   ;;  %v745_v9 = vld [vmem:[%s982_s9 + $0x10] sm:$0xff]   ;;  %s290_s5 = scalar_lea.vmem [#allocation6], %s624_s25  ;;  %s636_s8 = sshll.u32 %s849_s18, 7 }
  0x2f   : > { %651 = vmatprep.subr.bf16.mxu0 %v862_v0  ;;  %446 = vperm.xlu0 %739, %v442_v4   ;;  %v746_v10 = vld [vmem:[%s982_s9 + $0x8] sm:$0xff]   ;;  %v747_v11 = vld [vmem:[%s982_s9] sm:$0xff]   ;;  %s308_s21 = scalar_select %p307_p8, %s849_s18, 1 }
  0x30   : > { %v748_v12 = vld [vmem:[%s1065_s0] sm:$0xff]   ;;  %s483_s7 = sshll.u32 %s290_s5, 4  ;;  %s1017_s11 = scalar_lea.hbm %s1069_s4, %s636_s8  ;;  %s1012_s7 = int_to_ptr.vmem [resolvable:$true] %s483_s7 }
  0x31   : > { %s309_s26 = scalar_lea.vmem %s1068_s3, %s308_s21  ;;  %s468_s27 = scalar_lea.sflag [#allocation5], %s978_s6 }
  0x32   : > { %v634_v15 = vld [vmem:[%s309_s26] ss:$0 sm:$0xff]  ;;  %s777_s12 = scalar_lea.vmem %s1012_s7, 256  ;;  %s865_s18 = smov [#allocation6]  }
  0x33   : > { %451 = vperm.xlu0 %739, %v443_v5   ;;  %p778_p12 = scmp.ne.s32.totalorder %s1012_s7, %s777_s12  ;;  %s781_s13 = sshll.u32 %s865_s18, 4  ;;  %s782_s13 = int_to_ptr.vmem [resolvable:$false] %s781_s13 }
  0x34   : > { %s783_s14 = scalar_lea.vmem %s782_s13, 512  ;;  %p784_p3 = scmp.lt.s32.totalorder %s1012_s7, %s782_s13 }
  0x35   : > { %p779_p0 = pnand %p778_p12, %p945_p9  ;;  %p785_p5 = scmp.lt.s32.totalorder %s783_s14, %s777_s12 }
  0x36   : > { %652 = vmatpush3.bf16.xpose.msra.mxu0 %v741_v3 }
  0x37   : > { %653 = vmatprep.subr.bf16.mxu0 %v862_v0  ;;  %p780_p1 = pneg %p779_p0  ;;  %p786_p6 = por %p785_p5, %p784_p3 }
  0x39   : > { %p787_p7 = pnand %p786_p6, %p780_p1 }
  0x3e   : > { %654 = vmatpush3.bf16.xpose.msra.mxu0 %v742_v6 }
  0x3f   : > { %655 = vmatprep.subr.bf16.mxu0 %v862_v0 }
  0x46   : > { %656 = vmatpush3.bf16.xpose.msra.mxu0 %v743_v7 }
  0x47   : > { %657 = vmatprep.subr.bf16.mxu0 %v862_v0 }
  0x4e   : > { %658 = vmatpush3.bf16.xpose.msra.mxu0 %v744_v8 }
  0x4f   : > { %659 = vmatprep.subr.bf16.mxu0 %v862_v0 }
  0x56   : > { %660 = vmatpush3.bf16.xpose.msra.mxu0 %v745_v9 }
  0x57   : > { %661 = vmatprep.subr.bf16.mxu0 %v862_v0 }
  0x5e   : > { %662 = vmatpush3.bf16.xpose.msra.mxu0 %v746_v10 }
  0x5f   : > { %663 = vmatprep.subr.bf16.mxu0 %v862_v0 }
  0x66   : > { %664 = vmatpush3.bf16.xpose.msra.mxu0 %v747_v11 }
  0x6d   : > { %666 = vmatmul.mubr.bf16.vlgmr.msra.gmra.mxu0 %v748_v12 }
  0xaa   : > { %v447_v13 = vpop.permute.xlu0 %446 }
  0xae   : > { %v452_v19 = vpop.permute.xlu0 %451 }
 0x12d   : > { %v426_v14 = vpop.f32.mrf.mxu0 }
 0x12e   : > { %v454_v16 = vmul.f32 %v447_v13, %v426_v14 }
 0x12f   : > { %v667_v17 = vpop.f32.mrf.mxu0 }
 0x130   : > { %v463_v18 = vmul.f32 %v634_v15, %v454_v16 }
 0x131   : > { %v429_v20 = vpop.f32.mrf.mxu0 }
 0x132   : > { %465 = vst [vmem:[%s290_s5] sm:$0xff] %v463_v18  ;;  %v455_v21 = vmul.f32 %v452_v19, %v429_v20 }
 0x133   : > { %v668_v22 = vpop.f32.mrf.mxu0 }
 0x134   : > { %v464_v23 = vmul.f32 %v634_v15, %v455_v21 }
 0x136   : > { %466 = vst [vmem:[%s290_s5 + $0x8] sm:$0xff] %v464_v23 }
 0x137   : > { %790 = shalt.err (!%p787_p7)
}
 0x138   : > { %s791_s21 = scalar_lea.hbm %s1017_s11, 256  ;;  %s795_s26 = scalar_lea.hbm %s1069_s4, 512 }
 0x139   : > { %p792_p10 = scmp.ne.s32.totalorder %s1017_s11, %s791_s21  ;;  %p796_p2 = scmp.lt.s32.totalorder %s1017_s11, %s1069_s4 }
 0x13a   : > { %p797_p8 = scmp.lt.s32.totalorder %s795_s26, %s791_s21 }
 0x13b   : > { %p793_p4 = pnand %p792_p10, %p945_p9 }
 0x13c   : > { %p798_p12 = por %p797_p8, %p796_p2 }
 0x13d   : > { %p794_p13 = pneg %p793_p4 }
 0x13f   : > { %p799_p0 = pnand %p798_p12, %p794_p13 }
 0x141   : > { %802 = shalt.err (!%p799_p0)
}
 0x142   : > { %s866_s8 = smov 128   ;;  %s867_s9 = smov 256  }
 0x143   : > { %s868_s10 = smov 8  }
 0x144   : > { %671 = dma.vmem_to_hbm [thread:$0]  (%p945_p9), %s1012_s7, 256, %s1017_s11, %s468_s27, %s866_s8, %s867_s9, %s868_s10  }
 0x145 PF: > { %s498_s12 = sand.u32 1, %s837_s15   ;;  %p1075_p1 = scmp.ge.s32.totalorder %s857_s20, 2 }
 0x146   : > { %s499_s18 = scalar_lea.sflag [#allocation5], %s498_s12 }
 0x147   : > { %p678_p3 = pnand %p1075_p1, %p952_p11 }
 0x149   : > { %p679_p5 = pneg %p678_p3 }
 0x14b   : > { %832 = dma.done.wait (%p679_p5), %s499_s18, 256  }
 0x14c   : > { %834 = vsyncadd (%p679_p5), %s499_s18, 4294967040  ;;  %s20_s20 = sadd.s32 1, %s857_s20   ;;  %s1076_s15 = smov %s841_s16 }
 0x14d   : > { %p17_p6 = scmp.ge.s32.totalorder %s20_s20, 4   ;;  %s1077_s16 = smov %s845_s17 }
 0x14e   : > { %s1078_s17 = smov %s950_s29  ;;  %s1079_s18 = smov %s853_s19 }
 0x14f   : > { %s1080_s19 = smov %s1082_s23  ;;  %19 = sbr.rel (!%p17_p6) target bundleno = 6 (0x6), region = 98 }
 0x154   :  { %504 = vsyncpa [#allocation4], 1 }
 0x155   :  { %506 = vsyncpa [#allocation4 + $0x1], 1 }
 0x156   :  { %507 = vsyncpa [#allocation5], 1 }
 0x157   :  { %509 = vsyncpa [#allocation5 + $0x1], 1 }

</bundles_post_ra>
